<compile_context>
chip_gen: v6e
topology: v6e:2x2x1
jax: 0.10.0
libtpu: 0.0.40
codegen_flags: <defaults>
</compile_context>

<pallas_src>
import functools
import math

import jax
import jax.numpy as jnp
from jax.experimental import pallas as pl
from jax.experimental.pallas import tpu as pltpu


def set_mlp_kernel(x_ref, w1_ref, b1_ref, w2_ref, b2_ref, w3_ref, b3_ref,
                   w4_ref, b4_ref, out_ref, *, set_size):
    rows = x_ref.shape[0]
    bblk = rows // set_size

    def mm(a, w_ref, b_ref):
        # bf16 MXU matmul with f32 accumulation; bias add stays in f32 (VPU).
        return jnp.dot(a.astype(jnp.bfloat16), w_ref[...],
                       preferred_element_type=jnp.float32) + b_ref[...]

    x = x_ref[...]                                   # (rows, d_in) bf16
    # encoder: Linear -> Sigmoid -> Linear -> Sigmoid
    h = jax.nn.sigmoid(mm(x, w1_ref, b1_ref))        # (rows, 3*dh) f32
    h = jax.nn.sigmoid(mm(h, w2_ref, b2_ref))        # (rows, dh)   f32
    # decoder: Linear -> Sigmoid -> Linear
    h = jax.nn.sigmoid(mm(h, w3_ref, b3_ref))        # (rows, dh)   f32
    h = mm(h, w4_ref, b4_ref)                        # (rows, d_out_pad) f32

    # sum over the set dimension, then sigmoid (all f32)
    d_out_pad = h.shape[-1]
    pooled = jnp.sum(h.reshape(bblk, set_size, d_out_pad), axis=1)
    out_ref[...] = jax.nn.sigmoid(pooled)            # (bblk, d_out_pad)


def _choose_batch_block(B, set_size, rows_target=256):
    """Pick a batch block so each grid step sees ~rows_target token rows."""
    B_blk = max(1, rows_target // max(set_size, 1))
    if B_blk >= B:
        return B, 1                                  # whole problem, one step
    B_blk = max(8, (B_blk // 8) * 8)                 # sublane-friendly blocks
    if B_blk >= B:
        return B, 1
    return B_blk, pl.cdiv(B, B_blk)


def set_mlp_forward(X, params, *, set_size, channel, rNr, rNc,
                    dim_hidden, dim_output):
    d_in = channel * rNr * rNc
    Xf = X.reshape(-1, set_size, d_in)
    B = Xf.shape[0]

    B_blk, n_blocks = _choose_batch_block(B, set_size)
    B_pad = B_blk * n_blocks
    if B_pad != B:
        Xf = jnp.pad(Xf, ((0, B_pad - B), (0, 0), (0, 0)))
    # Flat token rows, shipped to VMEM as bf16 (halves activation DMA bytes).
    X2 = Xf.reshape(B_pad * set_size, d_in).astype(jnp.bfloat16)
    rows_blk = B_blk * set_size

    # lane-dense output: pad the output feature dim to a multiple of 128
    d_out_pad = 128 * pl.cdiv(max(dim_output, 1), 128)
    w4p = jnp.pad(params["w4"], ((0, 0), (0, d_out_pad - dim_output)))
    b4p = jnp.pad(params["b4"], ((0, 0), (0, d_out_pad - dim_output)))

    # weights in bf16 for the MXU; biases stay f32 for the f32 epilogue
    weights = [
        params["w1"].astype(jnp.bfloat16), params["b1"].astype(jnp.float32),
        params["w2"].astype(jnp.bfloat16), params["b2"].astype(jnp.float32),
        params["w3"].astype(jnp.bfloat16), params["b3"].astype(jnp.float32),
        w4p.astype(jnp.bfloat16),          b4p.astype(jnp.float32),
    ]

    def full_spec(p):
        n = p.ndim
        return pl.BlockSpec(p.shape, lambda i, n=n: (0,) * n)

    kernel = functools.partial(set_mlp_kernel, set_size=set_size)

    out = pl.pallas_call(
        kernel,
        out_shape=jax.ShapeDtypeStruct((B_pad, d_out_pad), jnp.float32),
        grid=(n_blocks,),
        in_specs=[pl.BlockSpec((rows_blk, d_in), lambda i: (i, 0))]
                 + [full_spec(p) for p in weights],
        out_specs=pl.BlockSpec((B_blk, d_out_pad), lambda i: (i, 0)),
        compiler_params=pltpu.CompilerParams(
            dimension_semantics=("parallel",)),
    )(X2, *weights)

    return out[:B, :dim_output]


def set_mlp_reference(X, params, *, set_size, channel, rNr, rNc,
                      dim_hidden, dim_output):
    """Pure-JAX f32 reference matching the PyTorch module exactly."""
    d_in = channel * rNr * rNc
    Xf = X.reshape(-1, set_size, d_in).astype(jnp.float32)
    sig = jax.nn.sigmoid
    h = sig(Xf @ params["w1"] + params["b1"])
    h = sig(h @ params["w2"] + params["b2"])
    h = sig(h @ params["w3"] + params["b3"])
    h = h @ params["w4"] + params["b4"]
    return sig(jnp.sum(h, axis=1))


def init_params(key, d_in, dim_hidden, dim_output):
    ks = jax.random.split(key, 8)
    dh = dim_hidden

    def lin(k, fan_in, fan_out):
        bound = 1.0 / math.sqrt(fan_in)
        return jax.random.uniform(k, (fan_in, fan_out), jnp.float32, -bound, bound)

    def bias(k, fan_in, fan_out):
        bound = 1.0 / math.sqrt(fan_in)
        return jax.random.uniform(k, (1, fan_out), jnp.float32, -bound, bound)

    return {
        "w1": lin(ks[0], d_in, 3 * dh),   "b1": bias(ks[1], d_in, 3 * dh),
        "w2": lin(ks[2], 3 * dh, dh),     "b2": bias(ks[3], 3 * dh, dh),
        "w3": lin(ks[4], dh, dh),         "b3": bias(ks[5], dh, dh),
        "w4": lin(ks[6], dh, dim_output), "b4": bias(ks[7], dh, dim_output),
    }


if __name__ == "__main__":
    # Module hyperparameters (small, consistent with Set_MLP.__init__):
    set_size = 8
    channel = 4
    Nr = Nc = 8
    kersize, stride = 3, 1
    rNr = (Nr - kersize) // stride + 1   # 6
    rNc = (Nc - kersize) // stride + 1   # 6
    dim_hidden = 32
    dim_output = 16
    B = 2
    d_in = channel * rNr * rNc           # 144

    key = jax.random.PRNGKey(0)
    kx, kp = jax.random.split(key)
    X = jax.random.normal(kx, (B, set_size, channel, rNr, rNc), jnp.float32)
    params = init_params(kp, d_in, dim_hidden, dim_output)

    cfg = dict(set_size=set_size, channel=channel, rNr=rNr, rNc=rNc,
               dim_hidden=dim_hidden, dim_output=dim_output)

    y = set_mlp_forward(X, params, **cfg)
    y = jax.block_until_ready(y)

    y_ref = set_mlp_reference(X, params, **cfg)
    assert y.shape == (B, dim_output)
    # kernel matmuls use bf16 operands (f32 accumulation), so allow bf16-level tolerance
    assert jnp.allclose(y, y_ref, rtol=2e-2, atol=2e-2), "mismatch vs JAX reference"

    print("KERNEL_OK")
</pallas_src>

<mosaic_0001>
module attributes {stable_mosaic.version = 11 : i64} {
  func.func @set_mlp_kernel(%arg0: i32, %arg1: memref<16x144xbf16, #tpu.memory_space<vmem>>, %arg2: memref<144x96xbf16, #tpu.memory_space<vmem>>, %arg3: memref<1x96xf32, #tpu.memory_space<vmem>>, %arg4: memref<96x32xbf16, #tpu.memory_space<vmem>>, %arg5: memref<1x32xf32, #tpu.memory_space<vmem>>, %arg6: memref<32x32xbf16, #tpu.memory_space<vmem>>, %arg7: memref<1x32xf32, #tpu.memory_space<vmem>>, %arg8: memref<32x128xbf16, #tpu.memory_space<vmem>>, %arg9: memref<1x128xf32, #tpu.memory_space<vmem>>, %arg10: memref<2x128xf32, #tpu.memory_space<vmem>>) attributes {dimension_semantics = [#tpu.dimension_semantics<parallel>], iteration_bounds = array<i64: 1>, scalar_prefetch = 0 : i64, scratch_operands = 0 : i64, tpu.core_type = #tpu.core_type<tc>, window_params = [{transform_indices = @transform_0, window_bounds = array<i64: 16, 144>}, {pipeline_mode = #tpu.pipeline_mode<synchronous>, transform_indices = @transform_1, window_bounds = array<i64: 144, 96>}, {pipeline_mode = #tpu.pipeline_mode<synchronous>, transform_indices = @transform_2, window_bounds = array<i64: 1, 96>}, {pipeline_mode = #tpu.pipeline_mode<synchronous>, transform_indices = @transform_3, window_bounds = array<i64: 96, 32>}, {pipeline_mode = #tpu.pipeline_mode<synchronous>, transform_indices = @transform_4, window_bounds = array<i64: 1, 32>}, {pipeline_mode = #tpu.pipeline_mode<synchronous>, transform_indices = @transform_5, window_bounds = array<i64: 32, 32>}, {pipeline_mode = #tpu.pipeline_mode<synchronous>, transform_indices = @transform_6, window_bounds = array<i64: 1, 32>}, {pipeline_mode = #tpu.pipeline_mode<synchronous>, transform_indices = @transform_7, window_bounds = array<i64: 32, 128>}, {pipeline_mode = #tpu.pipeline_mode<synchronous>, transform_indices = @transform_8, window_bounds = array<i64: 1, 128>}, {transform_indices = @transform_9, window_bounds = array<i64: 2, 128>}]} {
    %c0 = arith.constant 0 : index
    %c0_0 = arith.constant 0 : index
    %0 = vector.load %arg1[%c0, %c0_0] : memref<16x144xbf16, #tpu.memory_space<vmem>>, vector<16x144xbf16>
    %c0_1 = arith.constant 0 : index
    %c0_2 = arith.constant 0 : index
    %1 = vector.load %arg2[%c0_1, %c0_2] : memref<144x96xbf16, #tpu.memory_space<vmem>>, vector<144x96xbf16>
    %cst = arith.constant dense<0.000000e+00> : vector<16x96xf32>
    %2 = tpu.matmul %0, %1, %cst {dimension_numbers = #tpu.dot_dimension_numbers<[1], [0], [0], [1], [0, 0, 1, 1], [], []>} : vector<16x144xbf16>, vector<144x96xbf16>, vector<16x96xf32> -> vector<16x96xf32>
    %c0_3 = arith.constant 0 : index
    %c0_4 = arith.constant 0 : index
    %3 = vector.load %arg3[%c0_3, %c0_4] : memref<1x96xf32, #tpu.memory_space<vmem>>, vector<1x96xf32>
    %4 = vector.broadcast %3 : vector<1x96xf32> to vector<16x96xf32>
    %5 = arith.addf %2, %4 : vector<16x96xf32>
    %6 = arith.negf %5 : vector<16x96xf32>
    %7 = math.exp %6 : vector<16x96xf32>
    %cst_5 = arith.constant 1.000000e+00 : f32
    %8 = vector.broadcast %cst_5 : f32 to vector<16x96xf32>
    %9 = arith.addf %8, %7 : vector<16x96xf32>
    %10 = arith.divf %8, %9 : vector<16x96xf32>
    %11 = arith.truncf %10 : vector<16x96xf32> to vector<16x96xbf16>
    %c0_6 = arith.constant 0 : index
    %c0_7 = arith.constant 0 : index
    %12 = vector.load %arg4[%c0_6, %c0_7] : memref<96x32xbf16, #tpu.memory_space<vmem>>, vector<96x32xbf16>
    %cst_8 = arith.constant dense<0.000000e+00> : vector<16x32xf32>
    %13 = tpu.matmul %11, %12, %cst_8 {dimension_numbers = #tpu.dot_dimension_numbers<[1], [0], [0], [1], [0, 0, 1, 1], [], []>} : vector<16x96xbf16>, vector<96x32xbf16>, vector<16x32xf32> -> vector<16x32xf32>
    %c0_9 = arith.constant 0 : index
    %c0_10 = arith.constant 0 : index
    %14 = vector.load %arg5[%c0_9, %c0_10] : memref<1x32xf32, #tpu.memory_space<vmem>>, vector<1x32xf32>
    %15 = vector.broadcast %14 : vector<1x32xf32> to vector<16x32xf32>
    %16 = arith.addf %13, %15 : vector<16x32xf32>
    %17 = arith.negf %16 : vector<16x32xf32>
    %18 = math.exp %17 : vector<16x32xf32>
    %cst_11 = arith.constant 1.000000e+00 : f32
    %19 = vector.broadcast %cst_11 : f32 to vector<16x32xf32>
    %20 = arith.addf %19, %18 : vector<16x32xf32>
    %21 = arith.divf %19, %20 : vector<16x32xf32>
    %22 = arith.truncf %21 : vector<16x32xf32> to vector<16x32xbf16>
    %c0_12 = arith.constant 0 : index
    %c0_13 = arith.constant 0 : index
    %23 = vector.load %arg6[%c0_12, %c0_13] : memref<32x32xbf16, #tpu.memory_space<vmem>>, vector<32x32xbf16>
    %cst_14 = arith.constant dense<0.000000e+00> : vector<16x32xf32>
    %24 = tpu.matmul %22, %23, %cst_14 {dimension_numbers = #tpu.dot_dimension_numbers<[1], [0], [0], [1], [0, 0, 1, 1], [], []>} : vector<16x32xbf16>, vector<32x32xbf16>, vector<16x32xf32> -> vector<16x32xf32>
    %c0_15 = arith.constant 0 : index
    %c0_16 = arith.constant 0 : index
    %25 = vector.load %arg7[%c0_15, %c0_16] : memref<1x32xf32, #tpu.memory_space<vmem>>, vector<1x32xf32>
    %26 = vector.broadcast %25 : vector<1x32xf32> to vector<16x32xf32>
    %27 = arith.addf %24, %26 : vector<16x32xf32>
    %28 = arith.negf %27 : vector<16x32xf32>
    %29 = math.exp %28 : vector<16x32xf32>
    %cst_17 = arith.constant 1.000000e+00 : f32
    %30 = vector.broadcast %cst_17 : f32 to vector<16x32xf32>
    %31 = arith.addf %30, %29 : vector<16x32xf32>
    %32 = arith.divf %30, %31 : vector<16x32xf32>
    %33 = arith.truncf %32 : vector<16x32xf32> to vector<16x32xbf16>
    %c0_18 = arith.constant 0 : index
    %c0_19 = arith.constant 0 : index
    %34 = vector.load %arg8[%c0_18, %c0_19] : memref<32x128xbf16, #tpu.memory_space<vmem>>, vector<32x128xbf16>
    %cst_20 = arith.constant dense<0.000000e+00> : vector<16x128xf32>
    %35 = tpu.matmul %33, %34, %cst_20 {dimension_numbers = #tpu.dot_dimension_numbers<[1], [0], [0], [1], [0, 0, 1, 1], [], []>} : vector<16x32xbf16>, vector<32x128xbf16>, vector<16x128xf32> -> vector<16x128xf32>
    %c0_21 = arith.constant 0 : index
    %c0_22 = arith.constant 0 : index
    %36 = vector.load %arg9[%c0_21, %c0_22] : memref<1x128xf32, #tpu.memory_space<vmem>>, vector<1x128xf32>
    %37 = vector.broadcast %36 : vector<1x128xf32> to vector<16x128xf32>
    %38 = arith.addf %35, %37 : vector<16x128xf32>
    %39 = vector.shape_cast %38 : vector<16x128xf32> to vector<2x8x128xf32>
    %cst_23 = arith.constant dense<0.000000e+00> : vector<2x128xf32>
    %40 = vector.multi_reduction <add>, %39, %cst_23 [1] : vector<2x8x128xf32> to vector<2x128xf32>
    %41 = arith.negf %40 : vector<2x128xf32>
    %42 = math.exp %41 : vector<2x128xf32>
    %cst_24 = arith.constant 1.000000e+00 : f32
    %43 = vector.broadcast %cst_24 : f32 to vector<2x128xf32>
    %44 = arith.addf %43, %42 : vector<2x128xf32>
    %45 = arith.divf %43, %44 : vector<2x128xf32>
    %c0_25 = arith.constant 0 : index
    %c0_26 = arith.constant 0 : index
    %46 = vector.load %arg10[%c0_25, %c0_26] : memref<2x128xf32, #tpu.memory_space<vmem>>, vector<2x128xf32>
    tpu.vector_store %arg10[%c0_25, %c0_26], %45 {strides = array<i32>} : memref<2x128xf32, #tpu.memory_space<vmem>>, vector<2x128xf32>,
    return
  }
  func.func @transform_0(%arg0: i32) -> (i32, i32) {
    %c0_i32 = arith.constant 0 : i32
    %c0_i32_0 = arith.constant 0 : i32
    return %arg0, %c0_i32 : i32, i32
  }
  func.func @transform_1(%arg0: i32) -> (i32, i32) {
    %c0_i32 = arith.constant 0 : i32
    %c0_i32_0 = arith.constant 0 : i32
    %c0_i32_1 = arith.constant 0 : i32
    return %c0_i32, %c0_i32_0 : i32, i32
  }
  func.func @transform_2(%arg0: i32) -> (i32, i32) {
    %c0_i32 = arith.constant 0 : i32
    %c0_i32_0 = arith.constant 0 : i32
    %c0_i32_1 = arith.constant 0 : i32
    return %c0_i32, %c0_i32_0 : i32, i32
  }
  func.func @transform_3(%arg0: i32) -> (i32, i32) {
    %c0_i32 = arith.constant 0 : i32
    %c0_i32_0 = arith.constant 0 : i32
    %c0_i32_1 = arith.constant 0 : i32
    return %c0_i32, %c0_i32_0 : i32, i32
  }
  func.func @transform_4(%arg0: i32) -> (i32, i32) {
    %c0_i32 = arith.constant 0 : i32
    %c0_i32_0 = arith.constant 0 : i32
    %c0_i32_1 = arith.constant 0 : i32
    return %c0_i32, %c0_i32_0 : i32, i32
  }
  func.func @transform_5(%arg0: i32) -> (i32, i32) {
    %c0_i32 = arith.constant 0 : i32
    %c0_i32_0 = arith.constant 0 : i32
    %c0_i32_1 = arith.constant 0 : i32
    return %c0_i32, %c0_i32_0 : i32, i32
  }
  func.func @transform_6(%arg0: i32) -> (i32, i32) {
    %c0_i32 = arith.constant 0 : i32
    %c0_i32_0 = arith.constant 0 : i32
    %c0_i32_1 = arith.constant 0 : i32
    return %c0_i32, %c0_i32_0 : i32, i32
  }
  func.func @transform_7(%arg0: i32) -> (i32, i32) {
    %c0_i32 = arith.constant 0 : i32
    %c0_i32_0 = arith.constant 0 : i32
    %c0_i32_1 = arith.constant 0 : i32
    return %c0_i32, %c0_i32_0 : i32, i32
  }
  func.func @transform_8(%arg0: i32) -> (i32, i32) {
    %c0_i32 = arith.constant 0 : i32
    %c0_i32_0 = arith.constant 0 : i32
    %c0_i32_1 = arith.constant 0 : i32
    return %c0_i32, %c0_i32_0 : i32, i32
  }
  func.func @transform_9(%arg0: i32) -> (i32, i32) {
    %c0_i32 = arith.constant 0 : i32
    %c0_i32_0 = arith.constant 0 : i32
    return %arg0, %c0_i32 : i32, i32
  }
}

</mosaic_0001>

<bundles_post_ra>
// kernel: tpu_custom_call.1
= control target key start
LH: loop header
LB: loop body
LE: loop exit
PB: predicated region body
PF: predicated region fallthrough
CT: control target
= control target key end

     0   :  { %14 = vsyncpa [#allocation3], 0  ;;  %s818_s0 = inlined_call_operand.vmem [shape: bf16[16,144], index: 0, kind: input, shape index: {}]   ;;  %s819_s1 = inlined_call_operand.hbm [shape: bf16[144,96], index: 1, kind: input, shape index: {}]   ;;  %s820_s2 = inlined_call_operand.vmem [shape: f32[1,96], index: 2, kind: input, shape index: {}]   ;;  %s821_s3 = inlined_call_operand.vmem [shape: bf16[96,32], index: 3, kind: input, shape index: {}]   ;;  %s822_s4 = inlined_call_operand.vmem [shape: f32[1,32], index: 4, kind: input, shape index: {}]   ;;  %s823_s5 = inlined_call_operand.vmem [shape: bf16[32,32], index: 5, kind: input, shape index: {}]   ;;  %s824_s6 = inlined_call_operand.vmem [shape: f32[1,32], index: 6, kind: input, shape index: {}]   ;;  %s825_s7 = inlined_call_operand.vmem [shape: bf16[32,128], index: 7, kind: input, shape index: {}]   ;;  %s826_s8 = inlined_call_operand.vmem [shape: f32[1,128], index: 8, kind: input, shape index: {}]   ;;  %s827_s9 = inlined_call_operand.hbm [shape: f32[2,128], index: 9, kind: output, shape index: {}]  }
   0x1   :  { %15 = vsyncpa [#allocation4], 0  ;;  %s689_s30 = smov [#allocation2]  }
   0x2   :  { %s23_s10 = sshll.u32 %s689_s30, 4  ;;  %s24_s10 = int_to_ptr.vmem [resolvable:$true] %s23_s10 }
   0x3   :  { %s653_s11 = scalar_lea.vmem %s24_s10, 1152  ;;  %p658_p1 = scmp.lt.s32.totalorder %s24_s10, %s24_s10 }
   0x4   :  { %p654_p0 = scmp.ne.s32.totalorder %s24_s10, %s653_s11  ;;  %p659_p2 = scmp.lt.s32.totalorder %s653_s11, %s653_s11 }
   0x6   :  { %p660_p3 = por %p659_p2, %p658_p1 }
   0x8   :  { %p661_p4 = pnand %p660_p3, %p654_p0 }
   0xa   :  { %664 = shalt.err (!%p661_p4)
}
   0xb   :  { %s690_s12 = smov 64   ;;  %s691_s13 = smov 4  }
   0xc   :  { %29 = dma.hbm_to_vmem [thread:$0]  %s819_s1, 1152, %s24_s10, [#allocation3], %s690_s12, %s690_s12, %s691_s13  }
   0xd   :  { %685 = dma.done.wait [#allocation3], 1152  }
   0xe   :  { %686 = vsyncadd [#allocation3], 4294966144  ;;  %v692_v0 = vmov 0   ;;  %v591_v1 = vld [vmem:[#allocation2 + $0x38] sm:$0xff]   ;;  %v592_v2 = vld [vmem:[#allocation2 + $0x30] sm:$0xff]   ;;  %vm138_vm0 = vcmask 130048  }
   0xf   :  { %142 = vmatprep.subr.bf16.mxu0 %v692_v0  ;;  %v593_v3 = vld [vmem:[#allocation2 + $0x28] sm:$0xff]   ;;  %v594_v4 = vld [vmem:[#allocation2 + $0x20] sm:$0xff]   ;;  %v595_v6 = vld [vmem:[#allocation2 + $0x18] sm:$0xff]   ;;  %v693_v13 = vmov 0.0   ;;  %vm694_vm1 = vmmov 0   ;;  %vm251_vm2 = vcmask 785408  }
  0x10   :  { %143 = vmatpush1.bf16.msra.mxu0 %v591_v1  ;;  %v602_v5 = vld [vmem:[%s818_s0 + $0x4] ss:$8 sps:$4 sm:$0xff]   ;;  %v596_v7 = vld [vmem:[#allocation2 + $0x10] sm:$0xff]   ;;  %v600_v11 = vld [vmem:[%s818_s0] ss:$8 sps:$4 sm:$0xff]   ;;  %552 = vmatprep.subr.bf16.mxu1 %v693_v13  ;;  %vm332_vm3 = vcmask 261120  }
  0x11   :  { %144 = vmatprep.subr.bf16.mxu0 %v692_v0  ;;  %514 = vmatprep.mubr.msk.bf16.mxu0 %vm138_vm0, %v602_v5  ;;  %v597_v8 = vld [vmem:[#allocation2 + $0x8] sm:$0xff]   ;;  %v598_v9 = vld [vmem:[#allocation2] sm:$0xff]   ;;  %v605_v15 = vld [vmem:[%s821_s3 + $0x18] sm:$0xff]   ;;  %vm483_vm4 = vcmask 1041409  }
  0x12   :  { %v599_v10 = vld [vmem:[#allocation2 + $0x40] sm:$0xff]   ;;  %v603_v12 = vld [vmem:[%s821_s3 + $0x28] sm:$0xff]   ;;  %v606_v16 = vld [vmem:[%s821_s3 + $0x10] sm:$0xff]   ;;  %564 = vmatprep.mubr.msk.bf16.mxu1 %vm694_vm1, %v693_v13 }
  0x13   :  { %553 = vmatpush3.bf16.msra.mxu1 %v603_v12  ;;  %v604_v14 = vld [vmem:[%s821_s3 + $0x20] sm:$0xff]   ;;  %v607_v17 = vld [vmem:[%s821_s3 + $0x8] sm:$0xff]  }
  0x14   :  { %145 = vmatpush1.bf16.msra.mxu0 %v592_v2  ;;  %554 = vmatprep.subr.bf16.mxu1 %v693_v13  ;;  %v608_v18 = vld [vmem:[%s821_s3] sm:$0xff]   ;;  %v609_v35 = vld [vmem:[%s823_s5 + $0x8] sm:$0xff]  }
  0x15   :  { %146 = vmatprep.subr.bf16.mxu0 %v692_v0  ;;  %v502_v19 = vld [vmem:[%s820_s2] ss:$0 sm:$0xff]  ;;  %v611_v53 = vld [vmem:[%s825_s7 + $0x8] sm:$0xff]  }
  0x16   :  { %v610_v36 = vld [vmem:[%s823_s5] sm:$0xff]  }
  0x17   :  { %555 = vmatpush3.bf16.msra.mxu1 %v604_v14  ;;  %v517_v37 = vld [vmem:[%s822_s4] ss:$0 sm:$0xff] }
  0x18   :  { %147 = vmatpush1.bf16.msra.mxu0 %v593_v3  ;;  %556 = vmatprep.subr.bf16.mxu1 %v693_v13  ;;  %v612_v54 = vld [vmem:[%s825_s7] sm:$0xff]  }
  0x19   :  { %148 = vmatprep.subr.bf16.mxu0 %v692_v0  ;;  %v527_v55 = vld [vmem:[%s824_s6] ss:$0 sm:$0xff] }
  0x1b   :  { %557 = vmatpush3.bf16.msra.mxu1 %v605_v15 }
  0x1c   :  { %149 = vmatpush1.bf16.msra.mxu0 %v594_v4  ;;  %558 = vmatprep.subr.bf16.mxu1 %v693_v13 }
  0x1d   :  { %150 = vmatprep.subr.bf16.mxu0 %v692_v0 }
  0x1f   :  { %559 = vmatpush3.bf16.msra.mxu1 %v606_v16 }
  0x20   :  { %151 = vmatpush1.bf16.msra.mxu0 %v595_v6  ;;  %560 = vmatprep.subr.bf16.mxu1 %v693_v13 }
  0x21   :  { %152 = vmatprep.subr.bf16.mxu0 %v692_v0 }
  0x23   :  { %561 = vmatpush3.bf16.msra.mxu1 %v607_v17 }
  0x24   :  { %153 = vmatpush1.bf16.msra.mxu0 %v596_v7  ;;  %562 = vmatprep.subr.bf16.mxu1 %v693_v13  ;;  %v533_v7 = vld [vmem:[%s826_s8] ss:$0 sm:$0xff]  ;;  %s695_s8 = smov [#allocation5]  }
  0x25   :  { %154 = vmatprep.subr.bf16.mxu0 %v692_v0  ;;  %s493_s18 = sshll.u32 %s695_s8, 4  ;;  %s494_s18 = int_to_ptr.vmem [resolvable:$true] %s493_s18 }
  0x26   :  { %s665_s19 = scalar_lea.vmem %s494_s18, 32  ;;  %p670_p6 = scmp.lt.s32.totalorder %s494_s18, %s494_s18 }
  0x27   :  { %563 = vmatpush3.bf16.msra.mxu1 %v608_v18  ;;  %p666_p5 = scmp.ne.s32.totalorder %s494_s18, %s665_s19  ;;  %p671_p7 = scmp.lt.s32.totalorder %s665_s19, %s665_s19 }
  0x28   :  { %155 = vmatpush1.bf16.msra.mxu0 %v597_v8  ;;  %568 = vmatprep.subr.bf16.mxu1 %v693_v13 }
  0x29   :  { %156 = vmatprep.subr.bf16.mxu0 %v692_v0  ;;  %p672_p8 = por %p671_p7, %p670_p6 }
  0x2b   :  { %p673_p9 = pnand %p672_p8, %p666_p5 }
  0x2c   :  { %157 = vmatpush1.bf16.msra.mxu0 %v598_v9 }
  0x2d   :  { %172 = vmatprep.subr.bf16.mxu0 %v692_v0 }
  0x30   :  { %173 = vmatpush2.bf16.msra.mxu0 %v599_v10 }
  0x33   :  { %175 = vmatmul.mubr.bf16.vlgmr.msra.gmra.mxu0 %v600_v11 }
  0xf3   :  { %v176_v20 = vpop.f32.mrf.mxu0 }
  0xf4   :  { %v177_v21 = vadd.f32 %v502_v19, %v176_v20 }
  0xf5   :  { %v178_v22 = vpop.f32.mrf.mxu0 }
  0xf6   :  { %v515_v23 = vmul.f32 -1.442695, %v177_v21 }
  0xf7   :  { %v179_v24 = vpop.f32.mrf.mxu0 }
  0xf8   :  { %613 = vpow2.f32 %v515_v23  ;;  %v180_v25 = vadd.f32 %v502_v19, %v179_v24 }
  0xf9   :  { %v181_v26 = vpop.f32.mrf.mxu0 }
  0xfa   :  { %v516_v27 = vmul.f32 -1.442695, %v180_v25 }
  0xfc   :  { %615 = vpow2.f32 %v516_v27 }
 0x105   :  { %v614_v28 = vpop.eup %613 }
 0x106   :  { %v189_v29 = vadd.f32 1.0, %v614_v28 }
 0x108   :  { %617 = vrcp.f32 %v189_v29 }
 0x109   :  { %v616_v30 = vpop.eup %615 }
 0x10a   :  { %v190_v31 = vadd.f32 1.0, %v616_v30 }
 0x10c   :  { %619 = vrcp.f32 %v190_v31 }
 0x115   :  { %v618_v32 = vpop.eup %617 }
 0x119   :  { %v620_v33 = vpop.eup %619 }
 0x11a   :  { %v195_v34 = vpack.c.bf16 %v620_v33, %v618_v32 }
 0x11c   :  { %565 = vmatmul.mubr.msk.bf16.vlgmr.msra.gmra.mxu1 %vm251_vm2, %v195_v34 }
 0x11d   :  { %572 = vmatprep.mubr.msk.bf16.mxu1 %vm694_vm1, %v693_v13  ;;  %569 = vmatpush3.bf16.msra.mxu1 %v609_v35 }
 0x11e   :  { %570 = vmatprep.subr.bf16.mxu1 %v693_v13 }
 0x121   :  { %571 = vmatpush3.bf16.msra.mxu1 %v610_v36 }
 0x122   :  { %576 = vmatprep.subr.bf16.mxu1 %v693_v13 }
 0x1dc   :  { %v289_v38 = vpop.f32.mrf.mxu1 }
 0x1dd   :  { %v290_v39 = vadd.f32 %v517_v37, %v289_v38 }
 0x1de   :  { %v566_v40 = vpop.f32.mrf.mxu1 }
 0x1df   :  { %v525_v41 = vmul.f32 -1.442695, %v290_v39 }
 0x1e0   :  { %v292_v42 = vpop.f32.mrf.mxu1 }
 0x1e1   :  { %621 = vpow2.f32 %v525_v41  ;;  %v293_v43 = vadd.f32 %v517_v37, %v292_v42 }
 0x1e2   :  { %v567_v44 = vpop.f32.mrf.mxu1 }
 0x1e3   :  { %v526_v45 = vmul.f32 -1.442695, %v293_v43 }
 0x1e5   :  { %623 = vpow2.f32 %v526_v45 }
 0x1ee   :  { %v622_v46 = vpop.eup %621 }
 0x1ef   :  { %v302_v47 = vadd.f32 1.0, %v622_v46 }
 0x1f1   :  { %625 = vrcp.f32 %v302_v47 }
 0x1f2   :  { %v624_v48 = vpop.eup %623 }
 0x1f3   :  { %v303_v49 = vadd.f32 1.0, %v624_v48 }
 0x1f5   :  { %627 = vrcp.f32 %v303_v49 }
 0x1fe   :  { %v626_v50 = vpop.eup %625 }
 0x202   :  { %v628_v51 = vpop.eup %627 }
 0x203   :  { %v308_v52 = vpack.c.bf16 %v628_v51, %v626_v50 }
 0x205   :  { %573 = vmatmul.mubr.msk.bf16.vlgmr.msra.gmra.mxu1 %vm332_vm3, %v308_v52 }
 0x206   :  { %580 = vmatprep.mubr.msk.bf16.mxu1 %vm694_vm1, %v693_v13  ;;  %577 = vmatpush3.bf16.msra.mxu1 %v611_v53 }
 0x207   :  { %578 = vmatprep.subr.bf16.mxu1 %v693_v13 }
 0x20a   :  { %579 = vmatpush3.bf16.msra.mxu1 %v612_v54 }
 0x2c5   :  { %v370_v56 = vpop.f32.mrf.mxu1 }
 0x2c6   :  { %v371_v57 = vadd.f32 %v527_v55, %v370_v56 }
 0x2c7   :  { %v574_v58 = vpop.f32.mrf.mxu1 }
 0x2c8   :  { %v531_v59 = vmul.f32 -1.442695, %v371_v57 }
 0x2c9   :  { %v373_v60 = vpop.f32.mrf.mxu1 }
 0x2ca   :  { %629 = vpow2.f32 %v531_v59  ;;  %v374_v61 = vadd.f32 %v527_v55, %v373_v60 }
 0x2cb   :  { %v575_v62 = vpop.f32.mrf.mxu1 }
 0x2cc   :  { %v532_v63 = vmul.f32 -1.442695, %v374_v61 }
 0x2ce   :  { %631 = vpow2.f32 %v532_v63 }
 0x2d7   :  { %v630_v0 = vpop.eup %629 }
 0x2d8   :  { %v383_v1 = vadd.f32 1.0, %v630_v0 }
 0x2da   :  { %633 = vrcp.f32 %v383_v1 }
 0x2db   :  { %v632_v2 = vpop.eup %631 }
 0x2dc   :  { %v384_v3 = vadd.f32 1.0, %v632_v2 }
 0x2de   :  { %635 = vrcp.f32 %v384_v3 }
 0x2e7   :  { %v634_v4 = vpop.eup %633 }
 0x2eb   :  { %v636_v5 = vpop.eup %635 }
 0x2ec   :  { %v389_v6 = vpack.c.bf16 %v636_v5, %v634_v4 }
 0x2ee   :  { %581 = vmatmul.mubr.msk.bf16.vlgmr.msra.gmra.mxu1 %vm332_vm3, %v389_v6 }
 0x3ae   :  { %v450_v8 = vpop.f32.mrf.mxu1 }
 0x3af   :  { %v451_v9 = vadd.f32 %v533_v7, %v450_v8 }
 0x3b0   :  { %v582_v10 = vpop.f32.mrf.mxu1 }
 0x3b1   :  { %v457_v11 = vrot.slane %v451_v9, 4 }
 0x3b2   :  { %v453_v12 = vpop.f32.mrf.mxu1 }
 0x3b3   :  { %v458_v13 = vadd.f32 %v457_v11, %v451_v9  ;;  %v454_v14 = vadd.f32 %v533_v7, %v453_v12 }
 0x3b4   :  { %v583_v15 = vpop.f32.mrf.mxu1 }
 0x3b5   :  { %v459_v16 = vrot.slane %v458_v13, 2  ;;  %v463_v17 = vrot.slane %v454_v14, 4 }
 0x3b7   :  { %v460_v18 = vadd.f32 %v459_v16, %v458_v13  ;;  %v464_v19 = vadd.f32 %v463_v17, %v454_v14 }
 0x3b9   :  { %v461_v20 = vrot.slane %v460_v18, 1  ;;  %v465_v21 = vrot.slane %v464_v19, 2 }
 0x3bb   :  { %v462_v22 = vadd.f32 %v461_v20, %v460_v18  ;;  %v466_v23 = vadd.f32 %v465_v21, %v464_v19 }
 0x3bd   :  { %v537_v24 = vmul.f32 -1.442695, %v462_v22  ;;  %v467_v25 = vrot.slane %v466_v23, 1 }
 0x3bf   :  { %637 = vpow2.f32 %v537_v24  ;;  %v468_v26 = vadd.f32 %v467_v25, %v466_v23 }
 0x3c1   :  { %v538_v27 = vmul.f32 -1.442695, %v468_v26 }
 0x3c3   :  { %639 = vpow2.f32 %v538_v27 }
 0x3cc   :  { %v638_v28 = vpop.eup %637 }
 0x3cd   :  { %v475_v29 = vadd.f32 1.0, %v638_v28 }
 0x3cf   :  { %641 = vrcp.f32 %v475_v29 }
 0x3d0   :  { %v640_v30 = vpop.eup %639 }
 0x3d1   :  { %v476_v31 = vadd.f32 1.0, %v640_v30 }
 0x3d3   :  { %643 = vrcp.f32 %v476_v31 }
 0x3dc   :  { %v642_v32 = vpop.eup %641 }
 0x3e0   :  { %v644_v33 = vpop.eup %643 }
 0x3e1   :  { %v484_v34 = vsel %vm483_vm4, %v644_v33, %v642_v32 }
 0x3e2   :  { %486 = vst [vmem:[#allocation5] sm:$0x3] %v484_v34 }
 0x3e3   :  { %676 = shalt.err (!%p673_p9)
}
 0x3e4   :  { %496 = dma.vmem_to_hbm [thread:$0]  %s494_s18, 32, %s827_s9, [#allocation4]  }
 0x3e5   :  { %687 = dma.done.wait [#allocation4], 32  }
 0x3e6   :  { %688 = vsyncadd [#allocation4], 4294967264 }
 0x3e7   :  { %500 = vsyncpa [#allocation3], 1 }
 0x3e8   :  { %501 = vsyncpa [#allocation4], 1 }

</bundles_post_ra>
